<compile_context>
chip_gen: v7x
topology: tpu7x:2x2x1
jax: 0.10.0
libtpu: 0.0.40
codegen_flags: <defaults>
</compile_context>

<pallas_src>
import functools
import math

import numpy as np
import jax
import jax.numpy as jnp
from jax.experimental import pallas as pl
from jax.experimental.pallas import tpu as pltpu

_VMEM_LIMIT = 32 * 1024 * 1024          # safe headroom on v5e/v6e/v7x
_MXU_DTYPE = jnp.bfloat16               # MXU operand dtype (f32 accumulate)


def _cparams():
    return pltpu.CompilerParams(
        dimension_semantics=("parallel",),
        vmem_limit_bytes=_VMEM_LIMIT,
    )


# ---------------------------------------------------------------------------
# Kernel 1: DataEmbedding (circular k=3 conv + timeF linear + positional)
#           fused with predict_linear over the time axis.
# ---------------------------------------------------------------------------
def _embed_predict_kernel(x_ref, mark_ref, tokw_ref, timew_ref, pos_ref,
                          pwt_ref, pb_ref, o_ref, *, L):
    f32 = jnp.float32
    x = x_ref[0]                                       # (L, Cin) f32
    xm = mark_ref[0]                                   # (L, Cm)  f32
    # circular taps (t-1, t, t+1) built in VMEM (no HBM roll/concat copies)
    x_prev = jnp.concatenate([x[L - 1:], x[:L - 1]], axis=0)
    x_next = jnp.concatenate([x[1:], x[:1]], axis=0)
    tw = tokw_ref[...]                                 # (3, Cin, D) bf16
    val = (jnp.dot(x_prev.astype(tw.dtype), tw[0], preferred_element_type=f32)
           + jnp.dot(x.astype(tw.dtype), tw[1], preferred_element_type=f32)
           + jnp.dot(x_next.astype(tw.dtype), tw[2], preferred_element_type=f32))
    mw = timew_ref[...]                                # (Cm, D) bf16
    emb = (val
           + jnp.dot(xm.astype(mw.dtype), mw, preferred_element_type=f32)
           + pos_ref[...])                             # (L, D) f32
    # predict_linear over the time axis: (T, L) @ (L, D) + b
    pwt = pwt_ref[...]                                 # (T, L) bf16
    out = jnp.dot(pwt, emb.astype(pwt.dtype), preferred_element_type=f32) \
        + pb_ref[...]                                  # (T, D) + (T, 1)
    o_ref[...] = out[None]


@jax.jit
def embed_predict(x0, x_mark, token_w, timef_w, pos_emb, predict_wt, predict_b):
    B, L, Cin = x0.shape
    Cm = x_mark.shape[-1]
    D = token_w.shape[-1]
    T = predict_wt.shape[0]
    return pl.pallas_call(
        functools.partial(_embed_predict_kernel, L=L),
        out_shape=jax.ShapeDtypeStruct((B, T, D), jnp.float32),
        grid=(B,),
        in_specs=[
            pl.BlockSpec((1, L, Cin), lambda b: (b, 0, 0)),
            pl.BlockSpec((1, L, Cm), lambda b: (b, 0, 0)),
            pl.BlockSpec((3, Cin, D), lambda b: (0, 0, 0)),
            pl.BlockSpec((Cm, D), lambda b: (0, 0)),
            pl.BlockSpec((L, D), lambda b: (0, 0)),
            pl.BlockSpec((T, L), lambda b: (0, 0)),
            pl.BlockSpec((T, 1), lambda b: (0, 0)),
        ],
        out_specs=pl.BlockSpec((1, T, D), lambda b: (b, 0, 0)),
        compiler_params=_cparams(),
    )(x0, x_mark, token_w, timef_w, pos_emb, predict_wt, predict_b)


# ---------------------------------------------------------------------------
# Kernel 2: fused TemporalConvNet (3 levels, kernel=2, dilations 1/2/4) +
#           AdaptiveAvgPool2d((T,1)) + post-pool ReLU for one period layout.
#           The conv "time" axis is either H (intra) or W (inter); activation
#           is kept flat as (H*W, C) so every matmul is a plain 2D MXU dot.
# ---------------------------------------------------------------------------
def _tcn_pool_kernel(x_ref, w_ref, b_ref, q_ref, t_ref, o_ref, *,
                     H, W, C, time_axis, n_levels):
    HW = H * W
    x = x_ref[0]                                       # (HW, C) f32
    w_all = w_ref[...]                                 # (n_levels, 2, 2C, C) bf16
    b_all = b_ref[...]                                 # (n_levels, 2, 1, C) f32
    tpos = t_ref[...]                                  # (HW, 1) f32 time coord
    l_time = H if time_axis == 0 else W
    row_step = W if time_axis == 0 else 1

    def shifted(a, d):
        # a at (time - d) with causal zero padding along the conv axis.
        if d >= l_time:
            return jnp.zeros_like(a)
        s = d * row_step
        sh = jnp.concatenate([jnp.zeros((s, C), a.dtype), a[:HW - s]], axis=0)
        return jnp.where(tpos >= d, sh, 0.0)

    def conv_relu(a, level, idx, d):
        wa = w_all[level, idx, :C, :]                  # tap (t - d)
        wb = w_all[level, idx, C:, :]                  # tap (t)
        y = (jnp.dot(shifted(a, d).astype(wa.dtype), wa,
                     preferred_element_type=jnp.float32)
             + jnp.dot(a.astype(wb.dtype), wb,
                       preferred_element_type=jnp.float32)
             + b_all[level, idx])
        return jnp.maximum(y, 0.0)

    h = x
    for level in range(n_levels):
        d = 2 ** level
        res = h
        h = conv_relu(h, level, 0, d)
        h = conv_relu(h, level, 1, d)
        h = jnp.maximum(h + res, 0.0)                  # residual (in/out chans equal)

    # AdaptiveAvgPool2d((T,1)) == one (T, H*W) averaging matmul; ReLU after pool.
    q = q_ref[...]                                     # (T, HW) bf16
    p = jnp.dot(q, h.astype(q.dtype), preferred_element_type=jnp.float32)
    o_ref[...] = jnp.maximum(p, 0.0)[None]


@functools.partial(jax.jit, static_argnames=("H", "W", "time_axis"))
def tcn_pool(x, wts, bias, q, tpos, *, H, W, time_axis):
    B, HW, C = x.shape
    assert HW == H * W
    n_levels = wts.shape[0]
    T = q.shape[0]
    return pl.pallas_call(
        functools.partial(_tcn_pool_kernel, H=H, W=W, C=C,
                          time_axis=time_axis, n_levels=n_levels),
        out_shape=jax.ShapeDtypeStruct((B, T, C), jnp.float32),
        grid=(B,),
        in_specs=[
            pl.BlockSpec((1, HW, C), lambda b: (b, 0, 0)),
            pl.BlockSpec((n_levels, 2, 2 * C, C), lambda b: (0, 0, 0, 0)),
            pl.BlockSpec((n_levels, 2, 1, C), lambda b: (0, 0, 0, 0)),
            pl.BlockSpec((T, HW), lambda b: (0, 0)),
            pl.BlockSpec((HW, 1), lambda b: (0, 0)),
        ],
        out_specs=pl.BlockSpec((1, T, C), lambda b: (b, 0, 0)),
        compiler_params=_cparams(),
    )(x, wts, bias, q, tpos)


# ---------------------------------------------------------------------------
# Kernel 3: softmax-weighted period sum + residual + shared LayerNorm.
#           Period weights come in as an SMEM scalar table (no lane-1 array).
# ---------------------------------------------------------------------------
def _combine_ln_kernel(pw_ref, *refs, k):
    res_refs = refs[:2 * k]
    x_ref, g_ref, beta_ref, o_ref = refs[2 * k:]
    b = pl.program_id(0)
    acc = x_ref[0]                                     # (T, N) f32
    for i in range(k):
        w = pw_ref[b, i]                               # scalar from SMEM
        acc = acc + (res_refs[2 * i][0] + res_refs[2 * i + 1][0]) * w
    mean = jnp.mean(acc, axis=-1, keepdims=True)
    var = jnp.mean((acc - mean) ** 2, axis=-1, keepdims=True)
    inv = jax.lax.rsqrt(var + 1e-5)
    o_ref[...] = ((acc - mean) * inv * g_ref[...] + beta_ref[...])[None]


@jax.jit
def combine_layernorm(pw, pooled, x, g, beta):
    B, T, N = x.shape
    k = len(pooled) // 2
    in_specs = ([pl.BlockSpec(memory_space=pltpu.MemorySpace.SMEM)]
                + [pl.BlockSpec((1, T, N), lambda b: (b, 0, 0)) for _ in pooled]
                + [pl.BlockSpec((1, T, N), lambda b: (b, 0, 0)),
                   pl.BlockSpec((1, N), lambda b: (0, 0)),
                   pl.BlockSpec((1, N), lambda b: (0, 0))])
    return pl.pallas_call(
        functools.partial(_combine_ln_kernel, k=k),
        out_shape=jax.ShapeDtypeStruct((B, T, N), jnp.float32),
        grid=(B,),
        in_specs=in_specs,
        out_specs=pl.BlockSpec((1, T, N), lambda b: (b, 0, 0)),
        compiler_params=_cparams(),
    )(pw, *pooled, x, g, beta)


# ---------------------------------------------------------------------------
# Kernel 4: final projection + de-normalization.
# ---------------------------------------------------------------------------
def _proj_denorm_kernel(e_ref, w_ref, b_ref, s_ref, m_ref, o_ref):
    e = e_ref[0]                                       # (T, D) f32
    w = w_ref[...]                                     # (D, Co) bf16
    y = jnp.dot(e.astype(w.dtype), w, preferred_element_type=jnp.float32) \
        + b_ref[...]
    o_ref[...] = (y * s_ref[0] + m_ref[0])[None]


@jax.jit
def project_denorm(enc, proj_w, proj_b, stdev, means):
    B, T, D = enc.shape
    Co = proj_w.shape[-1]
    return pl.pallas_call(
        _proj_denorm_kernel,
        out_shape=jax.ShapeDtypeStruct((B, T, Co), jnp.float32),
        grid=(B,),
        in_specs=[
            pl.BlockSpec((1, T, D), lambda b: (b, 0, 0)),
            pl.BlockSpec((D, Co), lambda b: (0, 0)),
            pl.BlockSpec((1, Co), lambda b: (0, 0)),
            pl.BlockSpec((1, 1, Co), lambda b: (b, 0, 0)),
            pl.BlockSpec((1, 1, Co), lambda b: (b, 0, 0)),
        ],
        out_specs=pl.BlockSpec((1, T, Co), lambda b: (b, 0, 0)),
        compiler_params=_cparams(),
    )(enc, proj_w, proj_b, stdev, means)


# ----------------------------- host-side helpers ---------------------------

@functools.lru_cache(maxsize=None)
def _pool_matrix(h_in, w_in, t_out):
    """AdaptiveAvgPool2d((t_out, 1)) on an (h_in, w_in) grid as a (T, H*W) matmul."""
    P = np.zeros((t_out, h_in * w_in), np.float32)
    for i in range(t_out):
        s = (i * h_in) // t_out
        e = -((-(i + 1) * h_in) // t_out)              # ceil
        P[i, s * w_in:e * w_in] = 1.0 / ((e - s) * w_in)
    return jnp.asarray(P, dtype=_MXU_DTYPE)


@functools.lru_cache(maxsize=None)
def _time_coord(h_in, w_in, time_axis):
    """Per-row time coordinate along the conv axis, shape (H*W, 1) f32."""
    r = np.arange(h_in * w_in)
    t = (r // w_in) if time_axis == 0 else (r % w_in)
    return jnp.asarray(t.astype(np.float32).reshape(h_in * w_in, 1))


@functools.partial(jax.jit, static_argnames=("k",))
def _fft_for_period(x, *, k):
    amp = jnp.abs(jnp.fft.rfft(x, axis=1))             # (B, F, N)
    freq = amp.mean(axis=0).mean(axis=-1)
    freq = freq.at[0].set(0.0)
    _, top = jax.lax.top_k(freq, k)
    pw = jnp.take(amp.mean(axis=-1), top, axis=1)      # (B, k)
    return top, jax.nn.softmax(pw, axis=1)


# ----------------------------- model forward -------------------------------

def times_block(x, blk, top_k, ln_g, ln_b):
    """TimesBlock + shared LayerNorm.  x: (B, T, N) f32."""
    B, T, N = x.shape
    top, pw = _fft_for_period(x, k=top_k)
    # TODO(synk): FFT_for_Period's data-dependent (period -> reshape) needs host
    # integers; rfft/top-k stay in XLA and only the k indices are synced here.
    top_host = np.maximum(np.asarray(jax.device_get(top)), 1)

    pooled = []
    for i in range(top_k):
        period = int(T // int(top_host[i]))
        if T % period != 0:
            length = ((T // period) + 1) * period
            z = jnp.concatenate(
                [x, jnp.zeros((B, length - T, N), x.dtype)], axis=1)
        else:
            length = T
            z = x
        H, W = length // period, period                # (B, length, N) == (B, H*W, N)
        Q = _pool_matrix(H, W, T)
        pooled.append(tcn_pool(z, blk["intra_w"], blk["intra_b"], Q,
                               _time_coord(H, W, 0), H=H, W=W, time_axis=0))
        pooled.append(tcn_pool(z, blk["inter_w"], blk["inter_b"], Q,
                               _time_coord(H, W, 1), H=H, W=W, time_axis=1))
    return combine_layernorm(pw, tuple(pooled), x, ln_g, ln_b)


def model_forward(params, cfg, x_enc, x_mark_enc, x_dec, x_mark_dec):
    del x_dec, x_mark_dec                              # unused in forecast path
    B, L, _ = x_enc.shape
    pred_len = cfg["pred_len"]

    # non-stationary normalization (tiny; left to XLA)
    means = x_enc.mean(axis=1, keepdims=True)
    x0 = x_enc - means
    stdev = jnp.sqrt(x0.var(axis=1, keepdims=True) + 1e-5)
    x0 = x0 / stdev

    # fused DataEmbedding + predict_linear -> (B, T, d_model)
    enc = embed_predict(x0, x_mark_enc, params["token_w"], params["timef_w"],
                        params["pos_emb"], params["predict_wt"],
                        params["predict_b"])

    for blk in params["blocks"]:
        enc = times_block(enc, blk, cfg["top_k"], params["ln_g"], params["ln_b"])

    dec = project_denorm(enc, params["proj_w"], params["proj_b"], stdev, means)
    return dec[:, -pred_len:, :]


# ----------------------------- parameter init ------------------------------

def init_params(cfg, key):
    D, Cin, Cm = cfg["d_model"], cfg["enc_in"], cfg["mark_dim"]
    L = cfg["seq_len"]
    T = cfg["seq_len"] + cfg["pred_len"]
    keys = iter(jax.random.split(key, 512))

    def nrm(shape, scale, dtype=jnp.float32):
        return (scale * jax.random.normal(next(keys), shape, jnp.float32)).astype(dtype)

    p = {}
    p["token_w"] = nrm((3, Cin, D), 1.0 / math.sqrt(3 * Cin), _MXU_DTYPE)
    p["timef_w"] = nrm((Cm, D), 1.0 / math.sqrt(Cm), _MXU_DTYPE)

    pe = np.zeros((L, D), np.float32)
    pos = np.arange(L, dtype=np.float32)[:, None]
    div = np.exp(np.arange(0, D, 2, dtype=np.float32) * -(math.log(10000.0) / D))
    pe[:, 0::2] = np.sin(pos * div)
    pe[:, 1::2] = np.cos(pos * div)
    p["pos_emb"] = jnp.asarray(pe)

    p["predict_wt"] = nrm((T, L), 1.0 / math.sqrt(L), _MXU_DTYPE)
    p["predict_b"] = nrm((T, 1), 0.02)
    p["ln_g"] = jnp.ones((1, D), jnp.float32)
    p["ln_b"] = jnp.zeros((1, D), jnp.float32)
    p["proj_w"] = nrm((D, cfg["c_out"]), 1.0 / math.sqrt(D), _MXU_DTYPE)
    p["proj_b"] = nrm((1, cfg["c_out"]), 0.02)

    def tcn_weights():
        # (levels, conv_idx, 2*C, C) with rows [W_tap(t-d); W_tap(t)]
        wts = jnp.stack([
            jnp.stack([nrm((2 * D, D), 1.0 / math.sqrt(2 * D)) for _ in range(2)])
            for _ in range(3)]).astype(_MXU_DTYPE)
        bias = jnp.stack([
            jnp.stack([nrm((1, D), 0.02) for _ in range(2)])
            for _ in range(3)])
        return wts, bias

    blocks = []
    for _ in range(cfg["e_layers"]):
        iw, ib = tcn_weights()
        ew, eb = tcn_weights()
        blocks.append({"intra_w": iw, "intra_b": ib,
                       "inter_w": ew, "inter_b": eb})
    p["blocks"] = blocks
    return p


# ---------------------------------- main ------------------------------------

if __name__ == "__main__":
    cfg = dict(
        task_name="long_term_forecast",
        seq_len=16, label_len=8, pred_len=8,
        e_layers=1, enc_in=4, d_model=16, d_ff=16, c_out=4,
        top_k=2, mark_dim=4,   # embed='timeF', freq='h' -> 4 time features
    )
    assert cfg["d_ff"] == cfg["d_model"], "model requires d_ff == d_model"
    assert cfg["c_out"] == cfg["enc_in"], "de-norm broadcast requires c_out == enc_in"

    key = jax.random.PRNGKey(0)
    k1, k2, kp = jax.random.split(key, 3)
    B = 2
    x_enc = jax.random.normal(k1, (B, cfg["seq_len"], cfg["enc_in"]), jnp.float32)
    x_mark_enc = jax.random.normal(k2, (B, cfg["seq_len"], cfg["mark_dim"]), jnp.float32)
    x_dec = jnp.zeros((B, cfg["label_len"] + cfg["pred_len"], cfg["enc_in"]), jnp.float32)
    x_mark_dec = jnp.zeros((B, cfg["label_len"] + cfg["pred_len"], cfg["mark_dim"]), jnp.float32)

    params = init_params(cfg, kp)
    out = model_forward(params, cfg, x_enc, x_mark_enc, x_dec, x_mark_dec)
    out = jax.block_until_ready(out)
    assert out.shape == (B, cfg["pred_len"], cfg["c_out"])
    assert bool(jnp.all(jnp.isfinite(out)))
    print("KERNEL_OK")
</pallas_src>

<mosaic_0001>
module attributes {stable_mosaic.version = 11 : i64} {
  func.func @_embed_predict_kernel(%arg0: i32, %arg1: memref<1x16x4xf32, #tpu.memory_space<vmem>>, %arg2: memref<1x16x4xf32, #tpu.memory_space<vmem>>, %arg3: memref<3x4x16xbf16, #tpu.memory_space<vmem>>, %arg4: memref<4x16xbf16, #tpu.memory_space<vmem>>, %arg5: memref<16x16xf32, #tpu.memory_space<vmem>>, %arg6: memref<24x16xbf16, #tpu.memory_space<vmem>>, %arg7: memref<24x1xf32, #tpu.memory_space<vmem>>, %arg8: memref<1x24x16xf32, #tpu.memory_space<vmem>>) attributes {dimension_semantics = [#tpu.dimension_semantics<parallel>], iteration_bounds = array<i64: 2>, scalar_prefetch = 0 : i64, scratch_operands = 0 : i64, tpu.core_type = #tpu.core_type<tc>, window_params = [{transform_indices = @transform_0, window_bounds = array<i64: 1, 16, 4>}, {transform_indices = @transform_1, window_bounds = array<i64: 1, 16, 4>}, {pipeline_mode = #tpu.pipeline_mode<synchronous>, transform_indices = @transform_2, window_bounds = array<i64: 3, 4, 16>}, {pipeline_mode = #tpu.pipeline_mode<synchronous>, transform_indices = @transform_3, window_bounds = array<i64: 4, 16>}, {pipeline_mode = #tpu.pipeline_mode<synchronous>, transform_indices = @transform_4, window_bounds = array<i64: 16, 16>}, {pipeline_mode = #tpu.pipeline_mode<synchronous>, transform_indices = @transform_5, window_bounds = array<i64: 24, 16>}, {pipeline_mode = #tpu.pipeline_mode<synchronous>, transform_indices = @transform_6, window_bounds = array<i64: 24, 1>}, {transform_indices = @transform_7, window_bounds = array<i64: 1, 24, 16>}]} {
    %c0 = arith.constant 0 : index
    %c0_0 = arith.constant 0 : index
    %c0_1 = arith.constant 0 : index
    %0 = vector.load %arg1[%c0, %c0_0, %c0_1] : memref<1x16x4xf32, #tpu.memory_space<vmem>>, vector<1x16x4xf32>
    %1 = vector.shape_cast %0 : vector<1x16x4xf32> to vector<16x4xf32>
    %c0_2 = arith.constant 0 : index
    %c0_3 = arith.constant 0 : index
    %c0_4 = arith.constant 0 : index
    %2 = vector.load %arg2[%c0_2, %c0_3, %c0_4] : memref<1x16x4xf32, #tpu.memory_space<vmem>>, vector<1x16x4xf32>
    %3 = vector.shape_cast %2 : vector<1x16x4xf32> to vector<16x4xf32>
    %4 = vector.extract_strided_slice %1 {offsets = [15, 0], sizes = [1, 4], strides = [1, 1]} : vector<16x4xf32> to vector<1x4xf32>
    %5 = vector.extract_strided_slice %1 {offsets = [0, 0], sizes = [15, 4], strides = [1, 1]} : vector<16x4xf32> to vector<15x4xf32>
    %6 = tpu.concatenate %4, %5 in 0 : vector<1x4xf32>, vector<15x4xf32> -> vector<16x4xf32>
    %7 = vector.extract_strided_slice %1 {offsets = [1, 0], sizes = [15, 4], strides = [1, 1]} : vector<16x4xf32> to vector<15x4xf32>
    %8 = vector.extract_strided_slice %1 {offsets = [0, 0], sizes = [1, 4], strides = [1, 1]} : vector<16x4xf32> to vector<1x4xf32>
    %9 = tpu.concatenate %7, %8 in 0 : vector<15x4xf32>, vector<1x4xf32> -> vector<16x4xf32>
    %c0_5 = arith.constant 0 : index
    %c0_6 = arith.constant 0 : index
    %c0_7 = arith.constant 0 : index
    %10 = vector.load %arg3[%c0_5, %c0_6, %c0_7] : memref<3x4x16xbf16, #tpu.memory_space<vmem>>, vector<3x4x16xbf16>
    %11 = arith.truncf %6 : vector<16x4xf32> to vector<16x4xbf16>
    %12 = vector.extract_strided_slice %10 {offsets = [0, 0, 0], sizes = [1, 4, 16], strides = [1, 1, 1]} : vector<3x4x16xbf16> to vector<1x4x16xbf16>
    %13 = vector.shape_cast %12 : vector<1x4x16xbf16> to vector<4x16xbf16>
    %cst = arith.constant dense<0.000000e+00> : vector<16x16xf32>
    %14 = tpu.matmul %11, %13, %cst {dimension_numbers = #tpu.dot_dimension_numbers<[1], [0], [0], [1], [0, 0, 1, 1], [], []>} : vector<16x4xbf16>, vector<4x16xbf16>, vector<16x16xf32> -> vector<16x16xf32>
    %15 = arith.truncf %1 : vector<16x4xf32> to vector<16x4xbf16>
    %16 = vector.extract_strided_slice %10 {offsets = [1, 0, 0], sizes = [1, 4, 16], strides = [1, 1, 1]} : vector<3x4x16xbf16> to vector<1x4x16xbf16>
    %17 = vector.shape_cast %16 : vector<1x4x16xbf16> to vector<4x16xbf16>
    %cst_8 = arith.constant dense<0.000000e+00> : vector<16x16xf32>
    %18 = tpu.matmul %15, %17, %cst_8 {dimension_numbers = #tpu.dot_dimension_numbers<[1], [0], [0], [1], [0, 0, 1, 1], [], []>} : vector<16x4xbf16>, vector<4x16xbf16>, vector<16x16xf32> -> vector<16x16xf32>
    %19 = arith.addf %14, %18 : vector<16x16xf32>
    %20 = arith.truncf %9 : vector<16x4xf32> to vector<16x4xbf16>
    %21 = vector.extract_strided_slice %10 {offsets = [2, 0, 0], sizes = [1, 4, 16], strides = [1, 1, 1]} : vector<3x4x16xbf16> to vector<1x4x16xbf16>
    %22 = vector.shape_cast %21 : vector<1x4x16xbf16> to vector<4x16xbf16>
    %cst_9 = arith.constant dense<0.000000e+00> : vector<16x16xf32>
    %23 = tpu.matmul %20, %22, %cst_9 {dimension_numbers = #tpu.dot_dimension_numbers<[1], [0], [0], [1], [0, 0, 1, 1], [], []>} : vector<16x4xbf16>, vector<4x16xbf16>, vector<16x16xf32> -> vector<16x16xf32>
    %24 = arith.addf %19, %23 : vector<16x16xf32>
    %c0_10 = arith.constant 0 : index
    %c0_11 = arith.constant 0 : index
    %25 = vector.load %arg4[%c0_10, %c0_11] : memref<4x16xbf16, #tpu.memory_space<vmem>>, vector<4x16xbf16>
    %26 = arith.truncf %3 : vector<16x4xf32> to vector<16x4xbf16>
    %cst_12 = arith.constant dense<0.000000e+00> : vector<16x16xf32>
    %27 = tpu.matmul %26, %25, %cst_12 {dimension_numbers = #tpu.dot_dimension_numbers<[1], [0], [0], [1], [0, 0, 1, 1], [], []>} : vector<16x4xbf16>, vector<4x16xbf16>, vector<16x16xf32> -> vector<16x16xf32>
    %28 = arith.addf %24, %27 : vector<16x16xf32>
    %c0_13 = arith.constant 0 : index
    %c0_14 = arith.constant 0 : index
    %29 = vector.load %arg5[%c0_13, %c0_14] : memref<16x16xf32, #tpu.memory_space<vmem>>, vector<16x16xf32>
    %30 = arith.addf %28, %29 : vector<16x16xf32>
    %c0_15 = arith.constant 0 : index
    %c0_16 = arith.constant 0 : index
    %31 = vector.load %arg6[%c0_15, %c0_16] : memref<24x16xbf16, #tpu.memory_space<vmem>>, vector<24x16xbf16>
    %32 = arith.truncf %30 : vector<16x16xf32> to vector<16x16xbf16>
    %cst_17 = arith.constant dense<0.000000e+00> : vector<24x16xf32>
    %33 = tpu.matmul %31, %32, %cst_17 {dimension_numbers = #tpu.dot_dimension_numbers<[1], [0], [0], [1], [0, 0, 1, 1], [], []>} : vector<24x16xbf16>, vector<16x16xbf16>, vector<24x16xf32> -> vector<24x16xf32>
    %c0_18 = arith.constant 0 : index
    %c0_19 = arith.constant 0 : index
    %34 = vector.load %arg7[%c0_18, %c0_19] : memref<24x1xf32, #tpu.memory_space<vmem>>, vector<24x1xf32>
    %35 = vector.broadcast %34 : vector<24x1xf32> to vector<24x16xf32>
    %36 = arith.addf %33, %35 : vector<24x16xf32>
    %37 = vector.shape_cast %36 : vector<24x16xf32> to vector<1x24x16xf32>
    %c0_20 = arith.constant 0 : index
    %c0_21 = arith.constant 0 : index
    %c0_22 = arith.constant 0 : index
    %38 = vector.load %arg8[%c0_20, %c0_21, %c0_22] : memref<1x24x16xf32, #tpu.memory_space<vmem>>, vector<1x24x16xf32>
    tpu.vector_store %arg8[%c0_20, %c0_21, %c0_22], %37 {strides = array<i32>} : memref<1x24x16xf32, #tpu.memory_space<vmem>>, vector<1x24x16xf32>,
    return
  }
  func.func @transform_0(%arg0: i32) -> (i32, i32, i32) {
    %c0_i32 = arith.constant 0 : i32
    %c0_i32_0 = arith.constant 0 : i32
    %c0_i32_1 = arith.constant 0 : i32
    return %arg0, %c0_i32, %c0_i32_0 : i32, i32, i32
  }
  func.func @transform_1(%arg0: i32) -> (i32, i32, i32) {
    %c0_i32 = arith.constant 0 : i32
    %c0_i32_0 = arith.constant 0 : i32
    %c0_i32_1 = arith.constant 0 : i32
    return %arg0, %c0_i32, %c0_i32_0 : i32, i32, i32
  }
  func.func @transform_2(%arg0: i32) -> (i32, i32, i32) {
    %c0_i32 = arith.constant 0 : i32
    %c0_i32_0 = arith.constant 0 : i32
    %c0_i32_1 = arith.constant 0 : i32
    %c0_i32_2 = arith.constant 0 : i32
    return %c0_i32, %c0_i32_0, %c0_i32_1 : i32, i32, i32
  }
  func.func @transform_3(%arg0: i32) -> (i32, i32) {
    %c0_i32 = arith.constant 0 : i32
    %c0_i32_0 = arith.constant 0 : i32
    %c0_i32_1 = arith.constant 0 : i32
    return %c0_i32, %c0_i32_0 : i32, i32
  }
  func.func @transform_4(%arg0: i32) -> (i32, i32) {
    %c0_i32 = arith.constant 0 : i32
    %c0_i32_0 = arith.constant 0 : i32
    %c0_i32_1 = arith.constant 0 : i32
    return %c0_i32, %c0_i32_0 : i32, i32
  }
  func.func @transform_5(%arg0: i32) -> (i32, i32) {
    %c0_i32 = arith.constant 0 : i32
    %c0_i32_0 = arith.constant 0 : i32
    %c0_i32_1 = arith.constant 0 : i32
    return %c0_i32, %c0_i32_0 : i32, i32
  }
  func.func @transform_6(%arg0: i32) -> (i32, i32) {
    %c0_i32 = arith.constant 0 : i32
    %c0_i32_0 = arith.constant 0 : i32
    %c0_i32_1 = arith.constant 0 : i32
    return %c0_i32, %c0_i32_0 : i32, i32
  }
  func.func @transform_7(%arg0: i32) -> (i32, i32, i32) {
    %c0_i32 = arith.constant 0 : i32
    %c0_i32_0 = arith.constant 0 : i32
    %c0_i32_1 = arith.constant 0 : i32
    return %arg0, %c0_i32, %c0_i32_0 : i32, i32, i32
  }
}

</mosaic_0001>

<bundles_post_ra>
// kernel: embed_predict.1
= control target key start
LH: loop header
LB: loop body
LE: loop exit
PB: predicated region body
PF: predicated region fallthrough
CT: control target
= control target key end

     0   :  { %s813_s24 = smov 0   ;;  %s887_s0 = inlined_call_operand.vmem [shape: f32[2,16,4], index: 0, kind: input, shape index: {}]   ;;  %s888_s1 = inlined_call_operand.vmem [shape: f32[2,16,4], index: 1, kind: input, shape index: {}]   ;;  %s889_s2 = inlined_call_operand.vmem [shape: bf16[3,4,16], index: 2, kind: input, shape index: {}]   ;;  %s890_s3 = inlined_call_operand.vmem [shape: bf16[4,16], index: 3, kind: input, shape index: {}]   ;;  %s891_s4 = inlined_call_operand.vmem [shape: f32[16,16], index: 4, kind: input, shape index: {}]   ;;  %s892_s5 = inlined_call_operand.vmem [shape: bf16[24,16], index: 5, kind: input, shape index: {}]   ;;  %s893_s6 = inlined_call_operand.vmem [shape: f32[24,1], index: 6, kind: input, shape index: {}]   ;;  %s894_s7 = inlined_call_operand.vmem [shape: f32[2,24,16], index: 7, kind: output, shape index: {}]  }
   0x1 LB: > { %s683_s25 = sadd.s32 4294967295, %s768_s24   ;;  %p687_p0 = scmp.ge.s32.totalorder %s768_s24, 1  ;;  %s768_s24 = sphi %s813_s24, %s17_s24  }
   0x2   : > { %p247_p1 = scmp.lt.s32.totalorder %s768_s24, 3 }
   0x4   : > { %p248_p2 = pnand %p687_p0, %p247_p1 }
   0x5   : > { %v323_v0 = vld [vmem:[%s889_s2 + $0x2] sm:$0x3] (!%p248_p2)  ;;  %vm331_vm0 = vcmask (!%p248_p2), 1041408   ;;  %p284_p3 = scmp.lt.s32.totalorder (!%p248_p2), %s683_s25, 1  ;;  %v770_v1 = vmov (!%p248_p2), 0.0   ;;  %vm771_vm1 = vmmov (!%p248_p2), 0  }
   0x6   : > { %251 = sbr.rel (%p248_p2) target bundleno = 472 (0x1d8), region = 48  ;;  %716 = vmatprep.subr.bf16.mxu0 (!%p248_p2), %v770_v1  ;;  %v333_v2 = vsel (!%p248_p2), %vm331_vm0, %v323_v0, 0  ;;  %718 = vmatprep.mubr.msk.bf16.mxu0 (!%p248_p2), %vm771_vm1, %v770_v1  ;;  %v322_v3 = vld [vmem:[%s889_s2] sm:$0x3] (!%p248_p2)  ;;  %v324_v5 = vld [vmem:[%s889_s2 + $0x4] sm:$0x3] (!%p248_p2) }
   0x7   : > { %717 = vmatpush3.bf16.msra.mxu0 (!%p248_p2), %v333_v2  ;;  %722 = vmatprep.subr.bf16.mxu1 (!%p248_p2), %v770_v1  ;;  %v380_v4 = vsel (!%p248_p2), %vm331_vm0, %v322_v3, 0  ;;  %vm327_vm2 = vcmask (!%p248_p2), 31744   ;;  %vm308_vm3 = vcmask (!%p248_p2), 1040384   ;;  %v473_v12 = vld [vmem:[%s890_s3] sm:$0x3] (!%p248_p2)  ;;  %v428_v14 = vsel (!%p248_p2), %vm331_vm0, %v324_v5, 0 }
   0x8   : > { %723 = vmatpush3.bf16.msra.mxu1 (!%p248_p2), %v380_v4  ;;  %724 = vmatprep.mubr.msk.bf16.mxu1 (!%p248_p2), %vm771_vm1, %v770_v1  ;;  %vm314_vm4 = vcmask (!%p248_p2), 1046528   ;;  %v479_v18 = vsel (!%p248_p2), %vm331_vm0, %v473_v12, 0  ;;  %v760_v25 = vld [vmem:[%s892_s5] sm:$0xff] (!%p248_p2)   ;;  %vm558_vm5 = vcmask (!%p248_p2), 130048   ;;  %v534_v27 = vld [vmem:[%s893_s6 + $0x10] sm:$0xff] (!%p248_p2)  ;;  %v772_v28 = vmov (!%p248_p2), 0  }
   0x9   : > { %728 = vmatprep.subr.bf16.mxu0 (!%p248_p2), %v770_v1  ;;  %734 = vmatprep.subr.bf16.mxu1 (!%p248_p2), %v770_v1  ;;  %v532_v26 = vld [vmem:[%s893_s6] sm:$0xff] (!%p248_p2)  ;;  %v533_v29 = vld [vmem:[%s893_s6 + $0x8] sm:$0xff] (!%p248_p2) }
   0xa   : > { %758 = vset.pattern.permute.xlu0 (!%p248_p2), %v772_v28  ;;  %759 = vset.pattern.permute.xlu1 (!%p248_p2), %v772_v28  ;;  %v524_v49 = vld [vmem:[%s891_s4] sm:$0xff] (!%p248_p2)  ;;  %v525_v51 = vld [vmem:[%s891_s4 + $0x8] sm:$0xff] (!%p248_p2) }
   0xb   : > { %537 = vperm.xlu0 (!%p248_p2), %758, %v532_v26   ;;  %547 = vperm.xlu1 (!%p248_p2), %759, %v534_v27   ;;  %v761_v57 = vld [vmem:[%s892_s5 + $0x8] ss:$0 sps:$4 sm:$0xff] (!%p248_p2)  }
   0xd   : > { %s896_s25 = smov (!%p284_p3, %s683_s25), 1 }
   0xe   : > { %s703_s30 = sshll.u32 %s896_s25, 4  ;;  %s746_s11 = smul.u32 24, %s896_s25 }
   0xf   : > { %s288_s10 = scalar_lea.vmem %s887_s0, %s703_s30  ;;  %s293_s17 = scalar_lea.vmem %s888_s1, %s703_s30  ;;  %542 = vperm.xlu0 %758, %v533_v29  }
  0x10   : > { %v300_v6 = vld [vmem:[%s288_s10] sm:$0xff]  ;;  %v301_v7 = vld [vmem:[%s288_s10 + $0x8] sm:$0xff]  ;;  %s298_s14 = scalar_lea.vmem %s894_s7, %s746_s11 }
  0x11   : > { %v305_v8 = vrot.slane %v301_v7, 7  ;;  %v309_v9 = vrot.slane %v300_v6, 7  ;;  %v315_v10 = vrot.slane %v300_v6, 1  ;;  %v316_v11 = vrot.slane %v301_v7, 1  ;;  %v302_v21 = vld [vmem:[%s293_s17] sm:$0xff]  ;;  %v303_v22 = vld [vmem:[%s293_s17 + $0x8] sm:$0xff] }
  0x12   : > { %v326_v13 = vpack.c.bf16 %v301_v7, %v300_v6  ;;  %v474_v24 = vpack.c.bf16 %v303_v22, %v302_v21 }
  0x13   : > { %v310_v15 = vsel %vm308_vm3, %v309_v9, %v305_v8  ;;  %v313_v16 = vsel %vm308_vm3, %v305_v8, %v309_v9  ;;  %v317_v19 = vsel %vm314_vm4, %v315_v10, %v316_v11  ;;  %v321_v20 = vsel %vm314_vm4, %v316_v11, %v315_v10 }
  0x14   : > { %719 = vmatmul.mubr.msk.bf16.vlgmr.msra.gmra.mrb[0].mxu0 %vm327_vm2, %v326_v13  ;;  %v325_v17 = vpack.c.bf16 %v310_v15, %v313_v16  ;;  %v423_v23 = vpack.c.bf16 %v321_v20, %v317_v19 }
  0x15   : > { %729 = vmatpush3.bf16.msra.mxu0 %v428_v14  ;;  %730 = vmatprep.mubr.msk.bf16.mxu0 %vm771_vm1, %v770_v1 }
  0x16   : > { %725 = vmatmul.mubr.msk.bf16.vlgmr.msra.gmra.mrb[0].mxu1 %vm327_vm2, %v325_v17 }
  0x17   : > { %735 = vmatpush3.bf16.msra.mxu1 %v479_v18  ;;  %736 = vmatprep.mubr.msk.bf16.mxu1 %vm771_vm1, %v770_v1 }
  0x1c   : > { %731 = vmatmul.mubr.msk.bf16.vlgmr.msra.gmra.mrb[4].mxu0 %vm327_vm2, %v423_v23 }
  0x1d   : > { %742 = vmatprep.mubr.msk.bf16.mxu0 %vm558_vm5, %v760_v25 }
  0x1e   : > { %737 = vmatmul.mubr.msk.bf16.vlgmr.msra.gmra.mrb[4].mxu1 %vm327_vm2, %v474_v24 }
  0x8a   : > { %v538_v58 = vpop.permute.xlu0 %537  ;;  %v548_v59 = vpop.permute.xlu1 %547 }
  0x8e   : > { %v543_v1 = vpop.permute.xlu0 %542 }
  0xe7   : > { %v369_v30 = vpop.f32.mrb[0].mxu0 }
  0xe8   : > { %v720_v31 = vpop.f32.mrb[1].mxu0 }
  0xe9   : > { %v372_v32 = vpop.f32.mrb[2].mxu0  ;;  %v416_v33 = vpop.f32.mrb[0].mxu1 }
  0xea   : > { %v721_v34 = vpop.f32.mrb[3].mxu0  ;;  %v417_v35 = vadd.f32 %v416_v33, %v369_v30  ;;  %v726_v36 = vpop.f32.mrb[1].mxu1 }
  0xeb   : > { %v419_v37 = vpop.f32.mrb[2].mxu1 }
  0xec   : > { %v420_v38 = vadd.f32 %v419_v37, %v372_v32  ;;  %v727_v39 = vpop.f32.mrb[3].mxu1 }
  0xef   : > { %v464_v40 = vpop.f32.mrb[4].mxu0 }
  0xf0   : > { %v471_v41 = vadd.f32 %v464_v40, %v417_v35  ;;  %v732_v42 = vpop.f32.mrb[5].mxu0 }
  0xf1   : > { %v467_v43 = vpop.f32.mrb[6].mxu0  ;;  %v515_v44 = vpop.f32.mrb[4].mxu1 }
  0xf2   : > { %v472_v45 = vadd.f32 %v467_v43, %v420_v38  ;;  %v733_v46 = vpop.f32.mrb[7].mxu0  ;;  %v522_v47 = vadd.f32 %v515_v44, %v471_v41  ;;  %v738_v48 = vpop.f32.mrb[5].mxu1 }
  0xf3   : > { %v518_v50 = vpop.f32.mrb[6].mxu1 }
  0xf4   : > { %v523_v52 = vadd.f32 %v518_v50, %v472_v45  ;;  %v739_v53 = vpop.f32.mrb[7].mxu1  ;;  %v526_v54 = vadd.f32 %v524_v49, %v522_v47 }
  0xf6   : > { %v527_v55 = vadd.f32 %v525_v51, %v523_v52 }
  0xf8   : > { %v531_v56 = vpack.c.bf16 %v527_v55, %v526_v54 }
  0xfa   : > { %740 = vmatprep.subr.bf16.mxu0 %v531_v56 }
  0xfb   : > { %741 = vmatpush3.bf16.msra.mxu0 %v531_v56 }
  0xfe   : > { %743 = vmatmul.mubr.msk.bf16.vlgmr.msra.gmra.mrb[8].mxu0 %vm558_vm5, %v761_v57 }
 0x1d1   : > { %v744_v60 = vpop.f32.mrb[8].mxu0 }
 0x1d2   : > { %v599_v61 = vpop.f32.mrb[9].mxu0  ;;  %v608_v62 = vadd.f32 %v744_v60, %v548_v59 }
 0x1d3   : > { %v600_v63 = vadd.f32 %v599_v61, %v538_v58  ;;  %v745_v0 = vpop.f32.mrb[10].mxu0 }
 0x1d4   : > { %v602_v2 = vpop.f32.mrb[11].mxu0  ;;  %615 = vst.msk [vmem:[%s298_s14 + $0x10] sm:$0xff] %vm558_vm5, %v608_v62 }
 0x1d5   : > { %613 = vst.msk [vmem:[%s298_s14] sm:$0xff] %vm558_vm5, %v600_v63  ;;  %v603_v3 = vadd.f32 %v602_v2, %v543_v1 }
 0x1d7   : > { %614 = vst.msk [vmem:[%s298_s14 + $0x8] sm:$0xff] %vm558_vm5, %v603_v3 }
 0x1d8 PF: > { %s17_s24 = sadd.s32 1, %s768_s24  }
 0x1d9   : > { %p14_p4 = scmp.ge.s32.totalorder %s17_s24, 4  }
 0x1db   :  { %16 = sbr.rel (!%p14_p4) target bundleno = 1 (0x1), region = 81 }

</bundles_post_ra>
